<compile_context>
chip_gen: v5e
topology: v5e:2x2
jax: 0.10.0
libtpu: 0.0.40
codegen_flags: <defaults>
</compile_context>

<pallas_src>
import functools

import jax
import jax.numpy as jnp
from jax.experimental import pallas as pl
from jax.experimental.pallas import tpu as pltpu


# MNIST: 28 x 28 flattened input, 10 classes.
LAYERS = [28 * 28, 100, 10, 100, 10, 100, 10]

LANE = 128      # vreg lane width
SUBLANE = 8     # f32 sublane count


def _round_up(n, m):
    return ((n + m - 1) // m) * m


def _cdiv(a, b):
    return (a + b - 1) // b


def _tpu_defaults():
    """(default batch tile, TensorCores per chip) by TPU generation."""
    try:
        kind = jax.devices()[0].device_kind.lower()
    except Exception:
        return 512, 1
    if "v5 lite" in kind or "v5lite" in kind or "v5e" in kind:
        # v5e: 128-wide MXU + single vector-store slot -> bigger M gains
        # little and risks spill pressure; cap the batch tile at 256.
        return 256, 1
    if "v7" in kind or "tpu7" in kind or "7x" in kind:
        # v7x: 2 TensorCores per chip share the 1-D "parallel" grid.
        return 512, 2
    return 512, 1


def _choose_tiling(batch, batch_tile, num_tc):
    """Balanced batch tiling; keeps every TensorCore busy on 2-TC chips."""
    b_min = _round_up(max(batch, SUBLANE), SUBLANE)
    n_tiles = max(1, _cdiv(b_min, batch_tile))
    if num_tc > 1:
        if n_tiles < num_tc and b_min >= num_tc * SUBLANE:
            n_tiles = num_tc                       # don't leave a TC idle
        if n_tiles > 1 and n_tiles % num_tc:
            n_tiles = _round_up(n_tiles, num_tc)   # even per-core tile count
    tile_b = _round_up(_cdiv(b_min, n_tiles), SUBLANE)
    return tile_b, tile_b * n_tiles, n_tiles


def _fused_mlp_kernel(x_ref, *refs):
    """Fused 6-layer MLP forward for one batch tile.

    refs = (w0, b0, w1, b1, ..., w5, b5, o_ref)
      x_ref : (TB, 784)              w0  : (784, 128)
      w_l   : (128, 128)  l >= 1     b_l : (1, 128)
      o_ref : (TB, 128)
    Matmuls run on the MXU with f32 accumulation; bias-add / ReLU on the VPU.
    Zero-padded lanes stay inert: padded W columns and bias lanes are 0, ReLU
    keeps them 0, and the next layer's padded K-rows are 0 as well.
    """
    *param_refs, o_ref = refs
    num_layers = len(param_refs) // 2

    y = x_ref[...]
    for l in range(num_layers):
        w = param_refs[2 * l][...]
        b = param_refs[2 * l + 1][...]
        y = jnp.dot(y, w, preferred_element_type=jnp.float32) + b
        if l < num_layers - 1:
            y = jnp.maximum(y, 0.0)
    o_ref[...] = y.astype(o_ref.dtype)


def prepare_params(params):
    """Zero-pad Net_Uniform parameters ONCE (hoisted out of the forward).

    params: list of (w, b) with w: (in, out), b: (1, out).
    Layer 0 keeps its true K (784) so the input needs no feature padding;
    deeper layers pad K to the previous layer's padded output width.
    Returns a flat tuple (w0, b0, w1, b1, ...).
    """
    flat = []
    for l, (w, b) in enumerate(params):
        in_f, out_f = w.shape
        out_p = _round_up(out_f, LANE)
        in_p = in_f if l == 0 else _round_up(in_f, LANE)
        w_p = jnp.zeros((in_p, out_p), w.dtype).at[:in_f, :out_f].set(w)
        b_p = jnp.zeros((1, out_p), b.dtype).at[:, :out_f].set(
            b.reshape(1, out_f))
        flat += [w_p, b_p]
    return tuple(flat)


@functools.partial(jax.jit, static_argnames=("out_features", "batch_tile"))
def net_uniform_forward(x, padded_params, out_features=10, batch_tile=None):
    """Forward pass of Net_Uniform as a single fused Pallas kernel.

    x:             (batch, 784) float32
    padded_params: output of prepare_params (padded once, reused every call)
    Returns (batch, out_features) float32.
    """
    batch, d0 = x.shape
    assert d0 == padded_params[0].shape[0], "input width must match layer 0"

    default_tile, num_tc = _tpu_defaults()
    tile = batch_tile if batch_tile is not None else default_tile
    tile_b, b_pad, n_tiles = _choose_tiling(batch, tile, num_tc)

    # Only the batch rows are (cheaply) padded; the 784 feature axis is left
    # untouched — the BlockSpec below covers the full feature dim.
    if b_pad != batch:
        x = jnp.pad(x, ((0, b_pad - batch), (0, 0)))

    d_last = padded_params[-1].shape[-1]   # padded output width (128)

    in_specs = [pl.BlockSpec((tile_b, d0), lambda i: (i, 0))]
    for p in padded_params:
        # Constant index_maps: weights/biases are DMA'd once and stay
        # resident in VMEM across all batch tiles.
        in_specs.append(pl.BlockSpec(p.shape, lambda i: (0, 0)))
    out_specs = pl.BlockSpec((tile_b, d_last), lambda i: (i, 0))

    # VMEM actually needed: double-buffered x/out tiles + resident params.
    param_bytes = sum(int(p.size) * p.dtype.itemsize for p in padded_params)
    need = 2 * (tile_b * d0 * 4) + 2 * (tile_b * d_last * 4) + 2 * param_bytes
    vmem_limit = min(max(16 * 1024 * 1024, 2 * need), 48 * 1024 * 1024)

    out_p = pl.pallas_call(
        _fused_mlp_kernel,
        out_shape=jax.ShapeDtypeStruct((b_pad, d_last), x.dtype),
        grid_spec=pltpu.PrefetchScalarGridSpec(
            num_scalar_prefetch=0,
            grid=(n_tiles,),
            in_specs=in_specs,
            out_specs=out_specs,
        ),
        compiler_params=pltpu.CompilerParams(
            dimension_semantics=("parallel",),   # shard batch tiles across TCs
            vmem_limit_bytes=vmem_limit,
        ),
    )(x, *padded_params)

    # Slice padding back off (batch rows and the 128 -> 10 output lanes).
    return out_p[:batch, :out_features]


def init_params(key, layers):
    """Deterministic parameter init mirroring Net_Uniform.__init__.

    weight ~ U(0, 1)   (as in `linear.weight.data.uniform_(0, 1)`)
    bias   ~ U(-1/sqrt(in), 1/sqrt(in))  (PyTorch nn.Linear default, untouched)
    Weights are stored transposed: (in_features, out_features).
    """
    params = []
    for in_f, out_f in zip(layers, layers[1:]):
        key, kw, kb = jax.random.split(key, 3)
        w = jax.random.uniform(kw, (in_f, out_f), dtype=jnp.float32,
                               minval=0.0, maxval=1.0)
        bound = 1.0 / (float(in_f) ** 0.5)
        b = jax.random.uniform(kb, (1, out_f), dtype=jnp.float32,
                               minval=-bound, maxval=bound)
        params.append((w, b))
    return params


def reference_forward(x, params):
    """Pure-JAX reference (full-f32 matmuls) for correctness checking."""
    num_layers = len(params)
    for layer_idx, (w, b) in enumerate(params):
        x = jnp.dot(x, w, precision=jax.lax.Precision.HIGHEST) + b
        if layer_idx < num_layers - 1:
            x = jnp.maximum(x, 0.0)
    return x


if __name__ == "__main__":
    key = jax.random.PRNGKey(0)
    key_params, key_x = jax.random.split(key)

    params = init_params(key_params, LAYERS)
    padded_params = prepare_params(params)   # padded once, reused every call

    # Small batch of flattened "MNIST-like" inputs in [0, 1).
    batch = 2
    x = jax.random.uniform(key_x, (batch, LAYERS[0]), dtype=jnp.float32)

    out = net_uniform_forward(x, padded_params, out_features=LAYERS[-1])
    out = jax.block_until_ready(out)

    ref = reference_forward(x, params)
    assert out.shape == (batch, LAYERS[-1])
    # Activations reach ~1e8 with U(0,1) weights, so only relative error is
    # meaningful; the loose rtol tolerates differing MXU f32 pass counts.
    rel_err = jnp.max(jnp.abs(out - ref)) / jnp.max(jnp.abs(ref))
    assert rel_err < 1e-2, f"mismatch vs reference (rel_err={rel_err})"

    print("KERNEL_OK")
</pallas_src>

<mosaic_0001>
module attributes {stable_mosaic.version = 11 : i64} {
  func.func @_fused_mlp_kernel(%arg0: i32, %arg1: memref<8x784xf32, #tpu.memory_space<vmem>>, %arg2: memref<784x128xf32, #tpu.memory_space<vmem>>, %arg3: memref<1x128xf32, #tpu.memory_space<vmem>>, %arg4: memref<128x128xf32, #tpu.memory_space<vmem>>, %arg5: memref<1x128xf32, #tpu.memory_space<vmem>>, %arg6: memref<128x128xf32, #tpu.memory_space<vmem>>, %arg7: memref<1x128xf32, #tpu.memory_space<vmem>>, %arg8: memref<128x128xf32, #tpu.memory_space<vmem>>, %arg9: memref<1x128xf32, #tpu.memory_space<vmem>>, %arg10: memref<128x128xf32, #tpu.memory_space<vmem>>, %arg11: memref<1x128xf32, #tpu.memory_space<vmem>>, %arg12: memref<128x128xf32, #tpu.memory_space<vmem>>, %arg13: memref<1x128xf32, #tpu.memory_space<vmem>>, %arg14: memref<8x128xf32, #tpu.memory_space<vmem>>) attributes {dimension_semantics = [#tpu.dimension_semantics<parallel>], iteration_bounds = array<i64: 1>, scalar_prefetch = 0 : i64, scratch_operands = 0 : i64, tpu.core_type = #tpu.core_type<tc>, window_params = [{transform_indices = @transform_0, window_bounds = array<i64: 8, 784>}, {pipeline_mode = #tpu.pipeline_mode<synchronous>, transform_indices = @transform_1, window_bounds = array<i64: 784, 128>}, {pipeline_mode = #tpu.pipeline_mode<synchronous>, transform_indices = @transform_2, window_bounds = array<i64: 1, 128>}, {pipeline_mode = #tpu.pipeline_mode<synchronous>, transform_indices = @transform_3, window_bounds = array<i64: 128, 128>}, {pipeline_mode = #tpu.pipeline_mode<synchronous>, transform_indices = @transform_4, window_bounds = array<i64: 1, 128>}, {pipeline_mode = #tpu.pipeline_mode<synchronous>, transform_indices = @transform_5, window_bounds = array<i64: 128, 128>}, {pipeline_mode = #tpu.pipeline_mode<synchronous>, transform_indices = @transform_6, window_bounds = array<i64: 1, 128>}, {pipeline_mode = #tpu.pipeline_mode<synchronous>, transform_indices = @transform_7, window_bounds = array<i64: 128, 128>}, {pipeline_mode = #tpu.pipeline_mode<synchronous>, transform_indices = @transform_8, window_bounds = array<i64: 1, 128>}, {pipeline_mode = #tpu.pipeline_mode<synchronous>, transform_indices = @transform_9, window_bounds = array<i64: 128, 128>}, {pipeline_mode = #tpu.pipeline_mode<synchronous>, transform_indices = @transform_10, window_bounds = array<i64: 1, 128>}, {pipeline_mode = #tpu.pipeline_mode<synchronous>, transform_indices = @transform_11, window_bounds = array<i64: 128, 128>}, {pipeline_mode = #tpu.pipeline_mode<synchronous>, transform_indices = @transform_12, window_bounds = array<i64: 1, 128>}, {transform_indices = @transform_13, window_bounds = array<i64: 8, 128>}]} {
    %c0 = arith.constant 0 : index
    %c0_0 = arith.constant 0 : index
    %0 = vector.load %arg1[%c0, %c0_0] : memref<8x784xf32, #tpu.memory_space<vmem>>, vector<8x784xf32>
    %c0_1 = arith.constant 0 : index
    %c0_2 = arith.constant 0 : index
    %1 = vector.load %arg2[%c0_1, %c0_2] : memref<784x128xf32, #tpu.memory_space<vmem>>, vector<784x128xf32>
    %c0_3 = arith.constant 0 : index
    %c0_4 = arith.constant 0 : index
    %2 = vector.load %arg3[%c0_3, %c0_4] : memref<1x128xf32, #tpu.memory_space<vmem>>, vector<1x128xf32>
    %cst = arith.constant dense<0.000000e+00> : vector<8x128xf32>
    %3 = tpu.matmul %0, %1, %cst {dimension_numbers = #tpu.dot_dimension_numbers<[1], [0], [0], [1], [0, 0, 1, 1], [], []>} : vector<8x784xf32>, vector<784x128xf32>, vector<8x128xf32> -> vector<8x128xf32>
    %4 = vector.broadcast %2 : vector<1x128xf32> to vector<8x128xf32>
    %5 = arith.addf %3, %4 : vector<8x128xf32>
    %cst_5 = arith.constant 0.000000e+00 : f32
    %6 = vector.broadcast %cst_5 : f32 to vector<8x128xf32>
    %7 = arith.maximumf %5, %6 : vector<8x128xf32>
    %c0_6 = arith.constant 0 : index
    %c0_7 = arith.constant 0 : index
    %8 = vector.load %arg4[%c0_6, %c0_7] : memref<128x128xf32, #tpu.memory_space<vmem>>, vector<128x128xf32>
    %c0_8 = arith.constant 0 : index
    %c0_9 = arith.constant 0 : index
    %9 = vector.load %arg5[%c0_8, %c0_9] : memref<1x128xf32, #tpu.memory_space<vmem>>, vector<1x128xf32>
    %cst_10 = arith.constant dense<0.000000e+00> : vector<8x128xf32>
    %10 = tpu.matmul %7, %8, %cst_10 {dimension_numbers = #tpu.dot_dimension_numbers<[1], [0], [0], [1], [0, 0, 1, 1], [], []>} : vector<8x128xf32>, vector<128x128xf32>, vector<8x128xf32> -> vector<8x128xf32>
    %11 = vector.broadcast %9 : vector<1x128xf32> to vector<8x128xf32>
    %12 = arith.addf %10, %11 : vector<8x128xf32>
    %cst_11 = arith.constant 0.000000e+00 : f32
    %13 = vector.broadcast %cst_11 : f32 to vector<8x128xf32>
    %14 = arith.maximumf %12, %13 : vector<8x128xf32>
    %c0_12 = arith.constant 0 : index
    %c0_13 = arith.constant 0 : index
    %15 = vector.load %arg6[%c0_12, %c0_13] : memref<128x128xf32, #tpu.memory_space<vmem>>, vector<128x128xf32>
    %c0_14 = arith.constant 0 : index
    %c0_15 = arith.constant 0 : index
    %16 = vector.load %arg7[%c0_14, %c0_15] : memref<1x128xf32, #tpu.memory_space<vmem>>, vector<1x128xf32>
    %cst_16 = arith.constant dense<0.000000e+00> : vector<8x128xf32>
    %17 = tpu.matmul %14, %15, %cst_16 {dimension_numbers = #tpu.dot_dimension_numbers<[1], [0], [0], [1], [0, 0, 1, 1], [], []>} : vector<8x128xf32>, vector<128x128xf32>, vector<8x128xf32> -> vector<8x128xf32>
    %18 = vector.broadcast %16 : vector<1x128xf32> to vector<8x128xf32>
    %19 = arith.addf %17, %18 : vector<8x128xf32>
    %cst_17 = arith.constant 0.000000e+00 : f32
    %20 = vector.broadcast %cst_17 : f32 to vector<8x128xf32>
    %21 = arith.maximumf %19, %20 : vector<8x128xf32>
    %c0_18 = arith.constant 0 : index
    %c0_19 = arith.constant 0 : index
    %22 = vector.load %arg8[%c0_18, %c0_19] : memref<128x128xf32, #tpu.memory_space<vmem>>, vector<128x128xf32>
    %c0_20 = arith.constant 0 : index
    %c0_21 = arith.constant 0 : index
    %23 = vector.load %arg9[%c0_20, %c0_21] : memref<1x128xf32, #tpu.memory_space<vmem>>, vector<1x128xf32>
    %cst_22 = arith.constant dense<0.000000e+00> : vector<8x128xf32>
    %24 = tpu.matmul %21, %22, %cst_22 {dimension_numbers = #tpu.dot_dimension_numbers<[1], [0], [0], [1], [0, 0, 1, 1], [], []>} : vector<8x128xf32>, vector<128x128xf32>, vector<8x128xf32> -> vector<8x128xf32>
    %25 = vector.broadcast %23 : vector<1x128xf32> to vector<8x128xf32>
    %26 = arith.addf %24, %25 : vector<8x128xf32>
    %cst_23 = arith.constant 0.000000e+00 : f32
    %27 = vector.broadcast %cst_23 : f32 to vector<8x128xf32>
    %28 = arith.maximumf %26, %27 : vector<8x128xf32>
    %c0_24 = arith.constant 0 : index
    %c0_25 = arith.constant 0 : index
    %29 = vector.load %arg10[%c0_24, %c0_25] : memref<128x128xf32, #tpu.memory_space<vmem>>, vector<128x128xf32>
    %c0_26 = arith.constant 0 : index
    %c0_27 = arith.constant 0 : index
    %30 = vector.load %arg11[%c0_26, %c0_27] : memref<1x128xf32, #tpu.memory_space<vmem>>, vector<1x128xf32>
    %cst_28 = arith.constant dense<0.000000e+00> : vector<8x128xf32>
    %31 = tpu.matmul %28, %29, %cst_28 {dimension_numbers = #tpu.dot_dimension_numbers<[1], [0], [0], [1], [0, 0, 1, 1], [], []>} : vector<8x128xf32>, vector<128x128xf32>, vector<8x128xf32> -> vector<8x128xf32>
    %32 = vector.broadcast %30 : vector<1x128xf32> to vector<8x128xf32>
    %33 = arith.addf %31, %32 : vector<8x128xf32>
    %cst_29 = arith.constant 0.000000e+00 : f32
    %34 = vector.broadcast %cst_29 : f32 to vector<8x128xf32>
    %35 = arith.maximumf %33, %34 : vector<8x128xf32>
    %c0_30 = arith.constant 0 : index
    %c0_31 = arith.constant 0 : index
    %36 = vector.load %arg12[%c0_30, %c0_31] : memref<128x128xf32, #tpu.memory_space<vmem>>, vector<128x128xf32>
    %c0_32 = arith.constant 0 : index
    %c0_33 = arith.constant 0 : index
    %37 = vector.load %arg13[%c0_32, %c0_33] : memref<1x128xf32, #tpu.memory_space<vmem>>, vector<1x128xf32>
    %cst_34 = arith.constant dense<0.000000e+00> : vector<8x128xf32>
    %38 = tpu.matmul %35, %36, %cst_34 {dimension_numbers = #tpu.dot_dimension_numbers<[1], [0], [0], [1], [0, 0, 1, 1], [], []>} : vector<8x128xf32>, vector<128x128xf32>, vector<8x128xf32> -> vector<8x128xf32>
    %39 = vector.broadcast %37 : vector<1x128xf32> to vector<8x128xf32>
    %40 = arith.addf %38, %39 : vector<8x128xf32>
    %c0_35 = arith.constant 0 : index
    %c0_36 = arith.constant 0 : index
    %41 = vector.load %arg14[%c0_35, %c0_36] : memref<8x128xf32, #tpu.memory_space<vmem>>, vector<8x128xf32>
    tpu.vector_store %arg14[%c0_35, %c0_36], %40 {strides = array<i32>} : memref<8x128xf32, #tpu.memory_space<vmem>>, vector<8x128xf32>,
    return
  }
  func.func @transform_0(%arg0: i32) -> (i32, i32) {
    %c0_i32 = arith.constant 0 : i32
    %c0_i32_0 = arith.constant 0 : i32
    return %arg0, %c0_i32 : i32, i32
  }
  func.func @transform_1(%arg0: i32) -> (i32, i32) {
    %c0_i32 = arith.constant 0 : i32
    %c0_i32_0 = arith.constant 0 : i32
    %c0_i32_1 = arith.constant 0 : i32
    return %c0_i32, %c0_i32_0 : i32, i32
  }
  func.func @transform_2(%arg0: i32) -> (i32, i32) {
    %c0_i32 = arith.constant 0 : i32
    %c0_i32_0 = arith.constant 0 : i32
    %c0_i32_1 = arith.constant 0 : i32
    return %c0_i32, %c0_i32_0 : i32, i32
  }
  func.func @transform_3(%arg0: i32) -> (i32, i32) {
    %c0_i32 = arith.constant 0 : i32
    %c0_i32_0 = arith.constant 0 : i32
    %c0_i32_1 = arith.constant 0 : i32
    return %c0_i32, %c0_i32_0 : i32, i32
  }
  func.func @transform_4(%arg0: i32) -> (i32, i32) {
    %c0_i32 = arith.constant 0 : i32
    %c0_i32_0 = arith.constant 0 : i32
    %c0_i32_1 = arith.constant 0 : i32
    return %c0_i32, %c0_i32_0 : i32, i32
  }
  func.func @transform_5(%arg0: i32) -> (i32, i32) {
    %c0_i32 = arith.constant 0 : i32
    %c0_i32_0 = arith.constant 0 : i32
    %c0_i32_1 = arith.constant 0 : i32
    return %c0_i32, %c0_i32_0 : i32, i32
  }
  func.func @transform_6(%arg0: i32) -> (i32, i32) {
    %c0_i32 = arith.constant 0 : i32
    %c0_i32_0 = arith.constant 0 : i32
    %c0_i32_1 = arith.constant 0 : i32
    return %c0_i32, %c0_i32_0 : i32, i32
  }
  func.func @transform_7(%arg0: i32) -> (i32, i32) {
    %c0_i32 = arith.constant 0 : i32
    %c0_i32_0 = arith.constant 0 : i32
    %c0_i32_1 = arith.constant 0 : i32
    return %c0_i32, %c0_i32_0 : i32, i32
  }
  func.func @transform_8(%arg0: i32) -> (i32, i32) {
    %c0_i32 = arith.constant 0 : i32
    %c0_i32_0 = arith.constant 0 : i32
    %c0_i32_1 = arith.constant 0 : i32
    return %c0_i32, %c0_i32_0 : i32, i32
  }
  func.func @transform_9(%arg0: i32) -> (i32, i32) {
    %c0_i32 = arith.constant 0 : i32
    %c0_i32_0 = arith.constant 0 : i32
    %c0_i32_1 = arith.constant 0 : i32
    return %c0_i32, %c0_i32_0 : i32, i32
  }
  func.func @transform_10(%arg0: i32) -> (i32, i32) {
    %c0_i32 = arith.constant 0 : i32
    %c0_i32_0 = arith.constant 0 : i32
    %c0_i32_1 = arith.constant 0 : i32
    return %c0_i32, %c0_i32_0 : i32, i32
  }
  func.func @transform_11(%arg0: i32) -> (i32, i32) {
    %c0_i32 = arith.constant 0 : i32
    %c0_i32_0 = arith.constant 0 : i32
    %c0_i32_1 = arith.constant 0 : i32
    return %c0_i32, %c0_i32_0 : i32, i32
  }
  func.func @transform_12(%arg0: i32) -> (i32, i32) {
    %c0_i32 = arith.constant 0 : i32
    %c0_i32_0 = arith.constant 0 : i32
    %c0_i32_1 = arith.constant 0 : i32
    return %c0_i32, %c0_i32_0 : i32, i32
  }
  func.func @transform_13(%arg0: i32) -> (i32, i32) {
    %c0_i32 = arith.constant 0 : i32
    %c0_i32_0 = arith.constant 0 : i32
    return %arg0, %c0_i32 : i32, i32
  }
}

</mosaic_0001>

<bundles_post_ra>
// kernel: net_uniform_forward.1
= control target key start
LH: loop header
LB: loop body
LE: loop exit
PB: predicated region body
PF: predicated region fallthrough
CT: control target
= control target key end

     0   :  { %18 = vsyncpa [#allocation3], 0  ;;  %s928_s0 = inlined_call_operand.vmem [shape: f32[8,784], index: 0, kind: input, shape index: {}]   ;;  %s929_s1 = inlined_call_operand.hbm [shape: f32[784,128], index: 1, kind: input, shape index: {}]   ;;  %s930_s2 = inlined_call_operand.vmem [shape: f32[1,128], index: 2, kind: input, shape index: {}]   ;;  %s931_s3 = inlined_call_operand.hbm [shape: f32[128,128], index: 3, kind: input, shape index: {}]   ;;  %s932_s4 = inlined_call_operand.vmem [shape: f32[1,128], index: 4, kind: input, shape index: {}]   ;;  %s933_s5 = inlined_call_operand.hbm [shape: f32[128,128], index: 5, kind: input, shape index: {}]   ;;  %s934_s6 = inlined_call_operand.vmem [shape: f32[1,128], index: 6, kind: input, shape index: {}]   ;;  %s935_s7 = inlined_call_operand.hbm [shape: f32[128,128], index: 7, kind: input, shape index: {}]   ;;  %s936_s8 = inlined_call_operand.vmem [shape: f32[1,128], index: 8, kind: input, shape index: {}]   ;;  %s937_s9 = inlined_call_operand.hbm [shape: f32[128,128], index: 9, kind: input, shape index: {}]   ;;  %s938_s10 = inlined_call_operand.vmem [shape: f32[1,128], index: 10, kind: input, shape index: {}]   ;;  %s939_s11 = inlined_call_operand.hbm [shape: f32[128,128], index: 11, kind: input, shape index: {}]   ;;  %s940_s12 = inlined_call_operand.vmem [shape: f32[1,128], index: 12, kind: input, shape index: {}]   ;;  %s941_s13 = inlined_call_operand.vmem [shape: f32[8,128], index: 13, kind: output, shape index: {}]  }
   0x1   :  { %19 = vsyncpa [#allocation5], 0 }
   0x2   :  { %20 = vsyncpa [#allocation8], 0 }
   0x3   :  { %21 = vsyncpa [#allocation11], 0  ;;  %s43_s27 = sshll.u32 %s931_s3, 4  ;;  %s772_s28 = smov [#allocation4]   ;;  %s44_s27 = int_to_ptr.hbm [resolvable:$true] %s43_s27 }
   0x4   :  { %s45_s29 = sshll.u32 %s772_s28, 4  ;;  %s73_s15 = sshll.u32 %s935_s7, 4  ;;  %s46_s29 = int_to_ptr.vmem [resolvable:$true] %s45_s29  ;;  %s74_s15 = int_to_ptr.hbm [resolvable:$true] %s73_s15 }
   0x5   :  { %s773_s16 = smov 128   ;;  %s774_s17 = smov 8  }
   0x6   :  { %51 = dma.hbm_to_vmem [thread:$0]  %s44_s27, 2048, %s46_s29, [#allocation5], %s773_s16, %s773_s16, %s774_s17  }
   0x7   :  { %s775_s18 = smov [#allocation7]   ;;  %s28_s3 = sshll.u32 %s929_s1, 4  ;;  %s29_s3 = int_to_ptr.hbm [resolvable:$true] %s28_s3 }
   0x8   :  { %s75_s19 = sshll.u32 %s775_s18, 4  ;;  %s58_s23 = sshll.u32 %s933_s5, 4  ;;  %s76_s19 = int_to_ptr.vmem [resolvable:$true] %s75_s19  ;;  %s59_s23 = int_to_ptr.hbm [resolvable:$true] %s58_s23 }
   0x9   :  { %81 = dma.hbm_to_vmem [thread:$0]  %s74_s15, 2048, %s76_s19, [#allocation8], %s773_s16, %s773_s16, %s774_s17  }
   0xa   :  { %s776_s24 = smov [#allocation2]   ;;  %s777_s26 = smov [#allocation6]  }
   0xb   :  { %s30_s25 = sshll.u32 %s776_s24, 4  ;;  %s60_s1 = sshll.u32 %s777_s26, 4  ;;  %s31_s25 = int_to_ptr.vmem [resolvable:$true] %s30_s25  ;;  %s61_s1 = int_to_ptr.vmem [resolvable:$true] %s60_s1 }
   0xc   :  { %36 = dma.hbm_to_vmem [thread:$0]  %s29_s3, 12544, %s31_s25, [#allocation3], %s773_s16, %s773_s16, %s774_s17  }
   0xd   :  { %s88_s29 = sshll.u32 %s937_s9, 4  ;;  %s103_s14 = sshll.u32 %s939_s11, 4  ;;  %s89_s29 = int_to_ptr.hbm [resolvable:$true] %s88_s29  ;;  %s104_s14 = int_to_ptr.hbm [resolvable:$true] %s103_s14 }
   0xe   :  { %66 = dma.hbm_to_vmem [thread:$0]  %s59_s23, 2048, %s61_s1, [#allocation5], %s773_s16, %s773_s16, %s774_s17  }
   0xf   :  { %s778_s15 = smov [#allocation9]   ;;  %s779_s19 = smov [#allocation10]  }
  0x10   :  { %s90_s18 = sshll.u32 %s778_s15, 4  ;;  %s105_s9 = sshll.u32 %s779_s19, 4  ;;  %s91_s18 = int_to_ptr.vmem [resolvable:$true] %s90_s18  ;;  %s106_s9 = int_to_ptr.vmem [resolvable:$true] %s105_s9 }
  0x11   :  { %96 = dma.hbm_to_vmem [thread:$0]  %s89_s29, 2048, %s91_s18, [#allocation8], %s773_s16, %s773_s16, %s774_s17  }
  0x12   :  { %111 = dma.hbm_to_vmem [thread:$0]  %s104_s14, 2048, %s106_s9, [#allocation11], %s773_s16, %s773_s16, %s774_s17  }
  0x13   :  { %764 = dma.done.wait [#allocation3], 12544  }
  0x14   :  { %765 = vsyncadd [#allocation3], 4294954752 }
  0x15   :  { %766 = dma.done.wait [#allocation5], 4096  }
  0x16   :  { %767 = vsyncadd [#allocation5], 4294963200 }
  0x17   :  { %768 = dma.done.wait [#allocation8], 4096  }
  0x18   :  { %769 = vsyncadd [#allocation8], 4294963200 }
  0x19   :  { %770 = dma.done.wait [#allocation11], 2048  }
  0x1a   :  { %771 = vsyncadd [#allocation11], 4294965248  ;;  %v160_v0 = vld [vmem:[#allocation2 + $0x78] sm:$0xff]  ;;  %v159_v1 = vld [vmem:[#allocation2 + $0x70] sm:$0xff]  ;;  %vm247_vm0 = vcmask 130048  }
  0x1b   :  { %v176_v2 = vld [vmem:[#allocation2 + $0xf8] sm:$0xff]  ;;  %251 = vmatpush.msra.mxu0 %v160_v0  ;;  %v175_v3 = vld [vmem:[#allocation2 + $0xf0] sm:$0xff]  ;;  %v158_v4 = vld [vmem:[#allocation2 + $0x68] sm:$0xff] }
  0x1c   :  { %271 = vmatpush.msra.mxu1 %v176_v2  ;;  %v174_v5 = vld [vmem:[#allocation2 + $0xe8] sm:$0xff]  ;;  %v157_v6 = vld [vmem:[#allocation2 + $0x60] sm:$0xff]  ;;  %v156_v8 = vld [vmem:[#allocation2 + $0x58] sm:$0xff] }
  0x1d   :  { %252 = vmatpush.msra.mxu0 %v159_v1  ;;  %v173_v7 = vld [vmem:[#allocation2 + $0xe0] sm:$0xff]  ;;  %v172_v9 = vld [vmem:[#allocation2 + $0xd8] sm:$0xff]  ;;  %v155_v10 = vld [vmem:[#allocation2 + $0x50] sm:$0xff] }
  0x1e   :  { %272 = vmatpush.msra.mxu1 %v175_v3  ;;  %v192_v11 = vld [vmem:[#allocation2 + $0x178] sm:$0xff]  ;;  %v171_v12 = vld [vmem:[#allocation2 + $0xd0] sm:$0xff]  ;;  %v190_v15 = vld [vmem:[#allocation2 + $0x168] sm:$0xff] }
  0x1f   :  { %253 = vmatpush.msra.mxu0 %v158_v4  ;;  %291 = vmatpush.msra.mxu2 %v192_v11  ;;  %v191_v13 = vld [vmem:[#allocation2 + $0x170] sm:$0xff]  ;;  %v208_v14 = vld [vmem:[#allocation2 + $0x1f8] sm:$0xff]  ;;  %v154_v17 = vld [vmem:[#allocation2 + $0x48] sm:$0xff] }
  0x20   :  { %273 = vmatpush.msra.mxu1 %v174_v5  ;;  %v207_v16 = vld [vmem:[#allocation2 + $0x1f0] sm:$0xff]  ;;  %v170_v18 = vld [vmem:[#allocation2 + $0xc8] sm:$0xff]  ;;  %311 = vmatpush.msra.mxu3 %v208_v14  ;;  %v189_v19 = vld [vmem:[#allocation2 + $0x160] sm:$0xff] }
  0x21   :  { %254 = vmatpush.msra.mxu0 %v157_v6  ;;  %292 = vmatpush.msra.mxu2 %v191_v13  ;;  %v206_v20 = vld [vmem:[#allocation2 + $0x1e8] sm:$0xff]  ;;  %v153_v21 = vld [vmem:[#allocation2 + $0x40] sm:$0xff]  ;;  %v188_v23 = vld [vmem:[#allocation2 + $0x158] sm:$0xff] }
  0x22   :  { %274 = vmatpush.msra.mxu1 %v173_v7  ;;  %v169_v22 = vld [vmem:[#allocation2 + $0xc0] sm:$0xff]  ;;  %312 = vmatpush.msra.mxu3 %v207_v16  ;;  %v152_v25 = vld [vmem:[#allocation2 + $0x38] sm:$0xff]  ;;  %v187_v27 = vld [vmem:[#allocation2 + $0x150] sm:$0xff] }
  0x23   :  { %255 = vmatpush.msra.mxu0 %v156_v8  ;;  %293 = vmatpush.msra.mxu2 %v190_v15  ;;  %v205_v24 = vld [vmem:[#allocation2 + $0x1e0] sm:$0xff]  ;;  %v168_v26 = vld [vmem:[#allocation2 + $0xb8] sm:$0xff]  ;;  %v151_v29 = vld [vmem:[#allocation2 + $0x30] sm:$0xff] }
  0x24   :  { %275 = vmatpush.msra.mxu1 %v172_v9  ;;  %313 = vmatpush.msra.mxu3 %v206_v20  ;;  %v204_v28 = vld [vmem:[#allocation2 + $0x1d8] sm:$0xff]  ;;  %v167_v30 = vld [vmem:[#allocation2 + $0xb0] sm:$0xff]  ;;  %v186_v31 = vld [vmem:[#allocation2 + $0x148] sm:$0xff] }
  0x25   :  { %256 = vmatpush.msra.mxu0 %v155_v10  ;;  %294 = vmatpush.msra.mxu2 %v189_v19  ;;  %v203_v32 = vld [vmem:[#allocation2 + $0x1d0] sm:$0xff]  ;;  %v150_v33 = vld [vmem:[#allocation2 + $0x28] sm:$0xff]  ;;  %v185_v35 = vld [vmem:[#allocation2 + $0x140] sm:$0xff] }
  0x26   :  { %276 = vmatpush.msra.mxu1 %v171_v12  ;;  %314 = vmatpush.msra.mxu3 %v205_v24  ;;  %v166_v34 = vld [vmem:[#allocation2 + $0xa8] sm:$0xff]  ;;  %v149_v37 = vld [vmem:[#allocation2 + $0x20] sm:$0xff]  ;;  %v184_v39 = vld [vmem:[#allocation2 + $0x138] sm:$0xff] }
  0x27   :  { %257 = vmatpush.msra.mxu0 %v154_v17  ;;  %295 = vmatpush.msra.mxu2 %v188_v23  ;;  %v202_v36 = vld [vmem:[#allocation2 + $0x1c8] sm:$0xff]  ;;  %v165_v38 = vld [vmem:[#allocation2 + $0xa0] sm:$0xff]  ;;  %v148_v41 = vld [vmem:[#allocation2 + $0x18] sm:$0xff] }
  0x28   :  { %277 = vmatpush.msra.mxu1 %v170_v18  ;;  %315 = vmatpush.msra.mxu3 %v204_v28  ;;  %v201_v40 = vld [vmem:[#allocation2 + $0x1c0] sm:$0xff]  ;;  %v164_v42 = vld [vmem:[#allocation2 + $0x98] sm:$0xff]  ;;  %v183_v43 = vld [vmem:[#allocation2 + $0x130] sm:$0xff] }
  0x29   :  { %258 = vmatpush.msra.mxu0 %v153_v21  ;;  %296 = vmatpush.msra.mxu2 %v187_v27  ;;  %v200_v44 = vld [vmem:[#allocation2 + $0x1b8] sm:$0xff]  ;;  %v147_v45 = vld [vmem:[#allocation2 + $0x10] sm:$0xff]  ;;  %v182_v47 = vld [vmem:[#allocation2 + $0x128] sm:$0xff] }
  0x2a   :  { %278 = vmatpush.msra.mxu1 %v169_v22  ;;  %316 = vmatpush.msra.mxu3 %v203_v32  ;;  %v163_v46 = vld [vmem:[#allocation2 + $0x90] sm:$0xff]  ;;  %v146_v49 = vld [vmem:[#allocation2 + $0x8] sm:$0xff]  ;;  %v181_v51 = vld [vmem:[#allocation2 + $0x120] sm:$0xff] }
  0x2b   :  { %259 = vmatpush.msra.mxu0 %v152_v25  ;;  %297 = vmatpush.msra.mxu2 %v186_v31  ;;  %v199_v48 = vld [vmem:[#allocation2 + $0x1b0] sm:$0xff]  ;;  %v162_v50 = vld [vmem:[#allocation2 + $0x88] sm:$0xff]  ;;  %v145_v53 = vld [vmem:[#allocation2] sm:$0xff] }
  0x2c   :  { %279 = vmatpush.msra.mxu1 %v168_v26  ;;  %317 = vmatpush.msra.mxu3 %v202_v36  ;;  %v198_v52 = vld [vmem:[#allocation2 + $0x1a8] sm:$0xff]  ;;  %v161_v54 = vld [vmem:[#allocation2 + $0x80] sm:$0xff]  ;;  %v224_v55 = vld [vmem:[#allocation2 + $0x278] sm:$0xff] }
  0x2d   :  { %260 = vmatpush.msra.mxu0 %v151_v29  ;;  %298 = vmatpush.msra.mxu2 %v185_v35  ;;  %v240_v56 = vld [vmem:[#allocation2 + $0x2f8] sm:$0xff]  ;;  %v197_v58 = vld [vmem:[#allocation2 + $0x1a0] sm:$0xff]  ;;  %v223_v59 = vld [vmem:[#allocation2 + $0x270] sm:$0xff] }
  0x2e   :  { %280 = vmatpush.msra.mxu1 %v167_v30  ;;  %318 = vmatpush.msra.mxu3 %v201_v40  ;;  %v180_v57 = vld [vmem:[#allocation2 + $0x118] sm:$0xff]  ;;  %v239_v60 = vld [vmem:[#allocation2 + $0x2f0] sm:$0xff]  ;;  %v222_v63 = vld [vmem:[#allocation2 + $0x268] sm:$0xff] }
  0x2f   :  { %261 = vmatpush.msra.mxu0 %v150_v33  ;;  %299 = vmatpush.msra.mxu2 %v184_v39  ;;  %v179_v61 = vld [vmem:[#allocation2 + $0x110] sm:$0xff]  ;;  %v196_v62 = vld [vmem:[#allocation2 + $0x198] sm:$0xff]  ;;  %v238_v0 = vld [vmem:[#allocation2 + $0x2e8] sm:$0xff] }
  0x30   :  { %281 = vmatpush.msra.mxu1 %v166_v34  ;;  %319 = vmatpush.msra.mxu3 %v200_v44  ;;  %v178_v1 = vld [vmem:[#allocation2 + $0x108] sm:$0xff]  ;;  %v195_v2 = vld [vmem:[#allocation2 + $0x190] sm:$0xff]  ;;  %v221_v3 = vld [vmem:[#allocation2 + $0x260] sm:$0xff] }
  0x31   :  { %262 = vmatpush.msra.mxu0 %v149_v37  ;;  %300 = vmatpush.msra.mxu2 %v183_v43  ;;  %v220_v4 = vld [vmem:[#allocation2 + $0x258] sm:$0xff]  ;;  %v237_v5 = vld [vmem:[#allocation2 + $0x2e0] sm:$0xff]  ;;  %v194_v8 = vld [vmem:[#allocation2 + $0x188] sm:$0xff] }
  0x32   :  { %282 = vmatpush.msra.mxu1 %v165_v38  ;;  %320 = vmatpush.msra.mxu3 %v199_v48  ;;  %v236_v6 = vld [vmem:[#allocation2 + $0x2d8] sm:$0xff]  ;;  %v177_v7 = vld [vmem:[#allocation2 + $0x100] sm:$0xff]  ;;  %v219_v9 = vld [vmem:[#allocation2 + $0x250] sm:$0xff] }
  0x33   :  { %263 = vmatpush.msra.mxu0 %v148_v41  ;;  %301 = vmatpush.msra.mxu2 %v182_v47  ;;  %v140_v10 = vld [vmem:[%s928_s0 + $0x10] sm:$0xff]  ;;  %v193_v11 = vld [vmem:[#allocation2 + $0x180] sm:$0xff]  ;;  %v242_v13 = vld [vmem:[#allocation2 + $0x308] sm:$0xff] }
  0x34   :  { %283 = vmatpush.msra.mxu1 %v164_v42  ;;  %321 = vmatpush.msra.mxu3 %v198_v52  ;;  %v235_v12 = vld [vmem:[#allocation2 + $0x2d0] sm:$0xff]  ;;  %v138_v14 = vld [vmem:[%s928_s0] sm:$0xff]  ;;  %v218_v15 = vld [vmem:[#allocation2 + $0x248] sm:$0xff] }
  0x35   :  { %264 = vmatpush.msra.mxu0 %v147_v45  ;;  %302 = vmatpush.msra.mxu2 %v181_v51  ;;  %v234_v16 = vld [vmem:[#allocation2 + $0x2c8] sm:$0xff]  ;;  %v141_v17 = vld [vmem:[%s928_s0 + $0x18] sm:$0xff]  ;;  %v217_v19 = vld [vmem:[#allocation2 + $0x240] sm:$0xff] }
  0x36   :  { %284 = vmatpush.msra.mxu1 %v163_v46  ;;  %322 = vmatpush.msra.mxu3 %v197_v58  ;;  %v139_v18 = vld [vmem:[%s928_s0 + $0x8] sm:$0xff]  ;;  %v233_v20 = vld [vmem:[#allocation2 + $0x2c0] sm:$0xff]  ;;  %v216_v23 = vld [vmem:[#allocation2 + $0x238] sm:$0xff] }
  0x37   :  { %265 = vmatpush.msra.mxu0 %v146_v49  ;;  %303 = vmatpush.msra.mxu2 %v180_v57  ;;  %v241_v21 = vld [vmem:[#allocation2 + $0x300] sm:$0xff]  ;;  %v407_v22 = vld [vmem:[#allocation4 + $0x78] sm:$0xff]  ;;  %v232_v24 = vld [vmem:[#allocation2 + $0x2b8] sm:$0xff] }
  0x38   :  { %285 = vmatpush.msra.mxu1 %v162_v50  ;;  %323 = vmatpush.msra.mxu3 %v196_v62  ;;  %v144_v25 = vld [vmem:[%s928_s0 + $0x30] sm:$0xff]  ;;  %v406_v26 = vld [vmem:[#allocation4 + $0x70] sm:$0xff]  ;;  %v405_v29 = vld [vmem:[#allocation4 + $0x68] sm:$0xff] }
  0x39   :  { %266 = vmatpush.msra.mxu0 %v145_v53  ;;  %304 = vmatpush.msra.mxu2 %v179_v61  ;;  %v215_v27 = vld [vmem:[#allocation2 + $0x230] sm:$0xff]  ;;  %v214_v30 = vld [vmem:[#allocation2 + $0x228] sm:$0xff]  ;;  %v213_v33 = vld [vmem:[#allocation2 + $0x220] sm:$0xff] }
  0x3a   :  { %286 = vmatpush.msra.mxu1 %v161_v54  ;;  %324 = vmatpush.msra.mxu3 %v195_v2  ;;  %v231_v28 = vld [vmem:[#allocation2 + $0x2b0] sm:$0xff]  ;;  %v230_v31 = vld [vmem:[#allocation2 + $0x2a8] sm:$0xff]  ;;  %v229_v34 = vld [vmem:[#allocation2 + $0x2a0] sm:$0xff] }
  0x3b   :  { %331 = vmatpush.msrb.mxu0 %v224_v55  ;;  %305 = vmatpush.msra.mxu2 %v178_v1  ;;  %v404_v32 = vld [vmem:[#allocation4 + $0x60] sm:$0xff]  ;;  %v403_v35 = vld [vmem:[#allocation4 + $0x58] sm:$0xff]  ;;  %v212_v36 = vld [vmem:[#allocation2 + $0x218] sm:$0xff] }
  0x3c   :  { %351 = vmatpush.msrb.mxu1 %v240_v56  ;;  %325 = vmatpush.msra.mxu3 %v194_v8  ;;  %v228_v37 = vld [vmem:[#allocation2 + $0x298] sm:$0xff]  ;;  %v402_v38 = vld [vmem:[#allocation4 + $0x50] sm:$0xff]  ;;  %v211_v39 = vld [vmem:[#allocation2 + $0x210] sm:$0xff] }
  0x3d   :  { %332 = vmatpush.msrb.mxu0 %v223_v59  ;;  %306 = vmatpush.msra.mxu2 %v177_v7  ;;  %v227_v40 = vld [vmem:[#allocation2 + $0x290] sm:$0xff]  ;;  %v401_v41 = vld [vmem:[#allocation4 + $0x48] sm:$0xff]  ;;  %v210_v42 = vld [vmem:[#allocation2 + $0x208] sm:$0xff] }
  0x3e   :  { %352 = vmatpush.msrb.mxu1 %v239_v60  ;;  %307 = vmatmul.f32.vlgmr.msra.gmra.mxu2 %v140_v10  ;;  %v226_v43 = vld [vmem:[#allocation2 + $0x288] sm:$0xff]  ;;  %v209_v44 = vld [vmem:[#allocation2 + $0x200] sm:$0xff]  ;;  %v400_v48 = vld [vmem:[#allocation4 + $0x40] sm:$0xff] }
  0x3f   :  { %333 = vmatpush.msrb.mxu0 %v222_v63  ;;  %326 = vmatpush.msra.mxu3 %v193_v11  ;;  %v225_v45 = vld [vmem:[#allocation2 + $0x280] sm:$0xff]  ;;  %v143_v47 = vld [vmem:[%s928_s0 + $0x28] sm:$0xff]  ;;  %v397_v51 = vld [vmem:[#allocation4 + $0x28] sm:$0xff] }
  0x40   :  { %353 = vmatpush.msrb.mxu1 %v238_v0  ;;  %385 = vmatpush.msrb.mxu2 %v242_v13  ;;  %v142_v46 = vld [vmem:[%s928_s0 + $0x20] sm:$0xff]  ;;  %v399_v49 = vld [vmem:[#allocation4 + $0x38] sm:$0xff]  ;;  %v396_v52 = vld [vmem:[#allocation4 + $0x20] sm:$0xff] }
  0x41   :  { %334 = vmatpush.msrb.mxu0 %v221_v3  ;;  %327 = vmatmul.f32.vlgmr.msra.gmra.mxu3 %v141_v17  ;;  %v398_v50 = vld [vmem:[#allocation4 + $0x30] sm:$0xff]  ;;  %v395_v53 = vld [vmem:[#allocation4 + $0x18] sm:$0xff]  ;;  %v393_v55 = vld [vmem:[#allocation4 + $0x8] sm:$0xff] }
  0x42   :  { %354 = vmatpush.msrb.mxu1 %v237_v5  ;;  %267 = vmatmul.f32.vlgmr.msra.gmra.mxu0 %v138_v14  ;;  %v394_v54 = vld [vmem:[#allocation4 + $0x10] sm:$0xff]  ;;  %v392_v56 = vld [vmem:[#allocation4] sm:$0xff]  ;;  %v448_v57 = vld [vmem:[#allocation6 + $0x78] sm:$0xff] }
  0x43   :  { %335 = vmatpush.msrb.mxu0 %v220_v4  ;;  %287 = vmatmul.f32.vlgmr.msra.gmra.mxu1 %v139_v18  ;;  %v447_v58 = vld [vmem:[#allocation6 + $0x70] sm:$0xff]  ;;  %v446_v59 = vld [vmem:[#allocation6 + $0x68] sm:$0xff]  ;;  %v445_v61 = vld [vmem:[#allocation6 + $0x60] sm:$0xff] }
  0x44   :  { %355 = vmatpush.msrb.mxu1 %v236_v6  ;;  %386 = vmatpush.msrb.mxu2 %v241_v21  ;;  %v614_v60 = vld [vmem:[%s930_s2] ss:$0 sm:$0xff]  ;;  %v444_v63 = vld [vmem:[#allocation6 + $0x58] sm:$0xff]  ;;  %v442_v3 = vld [vmem:[#allocation6 + $0x48] sm:$0xff] }
  0x45   :  { %336 = vmatpush.msrb.mxu0 %v219_v9  ;;  %412 = vmatpush.msrb.mxu3 %v407_v22  ;;  %v443_v1 = vld [vmem:[#allocation6 + $0x50] sm:$0xff]  ;;  %v441_v5 = vld [vmem:[#allocation6 + $0x40] sm:$0xff]  ;;  %v440_v7 = vld [vmem:[#allocation6 + $0x38] sm:$0xff] }
  0x46   :  { %356 = vmatpush.msrb.mxu1 %v235_v12  ;;  %605 = vmatmul.msk.f32.vlgmr.msrb.gmra.mxu2 %vm247_vm0, %v144_v25  ;;  %v439_v9 = vld [vmem:[#allocation6 + $0x30] sm:$0xff]  ;;  %v438_v11 = vld [vmem:[#allocation6 + $0x28] sm:$0xff]  ;;  %v437_v13 = vld [vmem:[#allocation6 + $0x20] sm:$0xff] }
  0x47   :  { %337 = vmatpush.msrb.mxu0 %v218_v15  ;;  %413 = vmatpush.msrb.mxu3 %v406_v26  ;;  %v436_v14 = vld [vmem:[#allocation6 + $0x18] sm:$0xff]  ;;  %v435_v22 = vld [vmem:[#allocation6 + $0x10] sm:$0xff] }
  0x48   :  { %357 = vmatpush.msrb.mxu1 %v234_v16  ;;  %453 = vmatpush.msra.mxu2 %v448_v57  ;;  %v489_v25 = vld [vmem:[#allocation7 + $0x78] sm:$0xff]  ;;  %v488_v26 = vld [vmem:[#allocation7 + $0x70] sm:$0xff] }
  0x49   :  { %338 = vmatpush.msrb.mxu0 %v217_v19  ;;  %414 = vmatpush.msrb.mxu3 %v405_v29  ;;  %v485_v29 = vld [vmem:[#allocation7 + $0x58] sm:$0xff] }
  0x4a   :  { %358 = vmatpush.msrb.mxu1 %v233_v20  ;;  %454 = vmatpush.msra.mxu2 %v447_v58  ;;  %v518_v57 = vld [vmem:[#allocation9 + $0x18] sm:$0xff]  ;;  %v616_v58 = vld [vmem:[%s934_s6] ss:$0 sm:$0xff] }
  0x4b   :  { %339 = vmatpush.msrb.mxu0 %v216_v23  ;;  %415 = vmatpush.msrb.mxu3 %v404_v32  ;;  %v434_v23 = vld [vmem:[#allocation6 + $0x8] sm:$0xff]  ;;  %v482_v32 = vld [vmem:[#allocation7 + $0x40] sm:$0xff] }
  0x4c   :  { %359 = vmatpush.msrb.mxu1 %v232_v24  ;;  %455 = vmatpush.msra.mxu2 %v446_v59  ;;  %v433_v24 = vld [vmem:[#allocation6] sm:$0xff] }
  0x4d   :  { %340 = vmatpush.msrb.mxu0 %v215_v27  ;;  %416 = vmatpush.msrb.mxu3 %v403_v35  ;;  %v487_v27 = vld [vmem:[#allocation7 + $0x68] sm:$0xff] }
  0x4e   :  { %360 = vmatpush.msrb.mxu1 %v231_v28  ;;  %456 = vmatpush.msra.mxu2 %v445_v61  ;;  %v486_v28 = vld [vmem:[#allocation7 + $0x60] sm:$0xff]  ;;  %v479_v35 = vld [vmem:[#allocation7 + $0x28] sm:$0xff] }
  0x4f   :  { %341 = vmatpush.msrb.mxu0 %v214_v30  ;;  %417 = vmatpush.msrb.mxu3 %v402_v38  ;;  %v484_v30 = vld [vmem:[#allocation7 + $0x50] sm:$0xff] }
  0x50   :  { %361 = vmatpush.msrb.mxu1 %v230_v31  ;;  %457 = vmatpush.msra.mxu2 %v444_v63  ;;  %v483_v31 = vld [vmem:[#allocation7 + $0x48] sm:$0xff]  ;;  %v615_v38 = vld [vmem:[%s932_s4] ss:$0 sm:$0xff] }
  0x51   :  { %342 = vmatpush.msrb.mxu0 %v213_v33  ;;  %418 = vmatpush.msrb.mxu3 %v401_v41  ;;  %v481_v33 = vld [vmem:[#allocation7 + $0x38] sm:$0xff]  ;;  %v516_v63 = vld [vmem:[#allocation9 + $0x8] sm:$0xff] }
  0x52   :  { %362 = vmatpush.msrb.mxu1 %v229_v34  ;;  %458 = vmatpush.msra.mxu2 %v443_v1  ;;  %v480_v34 = vld [vmem:[#allocation7 + $0x30] sm:$0xff]  ;;  %v571_v1 = vld [vmem:[#allocation10 + $0x78] sm:$0xff] }
  0x53   :  { %343 = vmatpush.msrb.mxu0 %v212_v36  ;;  %419 = vmatpush.msrb.mxu3 %v400_v48  ;;  %v478_v36 = vld [vmem:[#allocation7 + $0x20] sm:$0xff] }
  0x54   :  { %363 = vmatpush.msrb.mxu1 %v228_v37  ;;  %459 = vmatpush.msra.mxu2 %v442_v3  ;;  %v477_v37 = vld [vmem:[#allocation7 + $0x18] sm:$0xff]  ;;  %v527_v48 = vld [vmem:[#allocation9 + $0x60] sm:$0xff]  ;;  %v569_v3 = vld [vmem:[#allocation10 + $0x68] sm:$0xff] }
  0x55   :  { %344 = vmatpush.msrb.mxu0 %v211_v39  ;;  %420 = vmatpush.msrb.mxu3 %v399_v49  ;;  %v526_v49 = vld [vmem:[#allocation9 + $0x58] sm:$0xff] }
  0x56   :  { %364 = vmatpush.msrb.mxu1 %v227_v40  ;;  %460 = vmatpush.msra.mxu2 %v441_v5  ;;  %v567_v5 = vld [vmem:[#allocation10 + $0x58] sm:$0xff] }
  0x57   :  { %345 = vmatpush.msrb.mxu0 %v210_v42  ;;  %421 = vmatpush.msrb.mxu3 %v398_v50  ;;  %v476_v42 = vld [vmem:[#allocation7 + $0x10] sm:$0xff] }
  0x58   :  { %365 = vmatpush.msrb.mxu1 %v226_v43  ;;  %461 = vmatpush.msra.mxu2 %v440_v7  ;;  %v475_v43 = vld [vmem:[#allocation7 + $0x8] sm:$0xff]  ;;  %v525_v50 = vld [vmem:[#allocation9 + $0x50] sm:$0xff] }
  0x59   :  { %346 = vmatpush.msrb.mxu0 %v209_v44  ;;  %422 = vmatpush.msrb.mxu3 %v397_v51  ;;  %v474_v44 = vld [vmem:[#allocation7] sm:$0xff]  ;;  %v524_v51 = vld [vmem:[#allocation9 + $0x48] sm:$0xff] }
  0x5a   :  { %366 = vmatpush.msrb.mxu1 %v225_v45  ;;  %347 = vmatmul.f32.vlgmr.msrb.gmra.mxu0 %v142_v46  ;;  %v530_v45 = vld [vmem:[#allocation9 + $0x78] sm:$0xff]  ;;  %v529_v46 = vld [vmem:[#allocation9 + $0x70] sm:$0xff]  ;;  %v565_v7 = vld [vmem:[#allocation10 + $0x48] sm:$0xff] }
  0x5b   :  { %367 = vmatmul.f32.vlgmr.msrb.gmra.mxu1 %v143_v47  ;;  %423 = vmatpush.msrb.mxu3 %v396_v52  ;;  %v528_v47 = vld [vmem:[#allocation9 + $0x68] sm:$0xff]  ;;  %v523_v52 = vld [vmem:[#allocation9 + $0x40] sm:$0xff] }
  0x5c   :  { %462 = vmatpush.msra.mxu2 %v439_v9  ;;  %494 = vmatpush.msra.mxu0 %v489_v25  ;;  %v563_v9 = vld [vmem:[#allocation10 + $0x38] sm:$0xff]  ;;  %v619_v25 = vld [vmem:[%s940_s12] ss:$0 sm:$0xff] }
  0x5d   :  { %424 = vmatpush.msrb.mxu3 %v395_v53  ;;  %535 = vmatpush.msra.mxu1 %v530_v45  ;;  %v522_v53 = vld [vmem:[#allocation9 + $0x38] sm:$0xff] }
  0x5e   :  { %463 = vmatpush.msra.mxu2 %v438_v11  ;;  %495 = vmatpush.msra.mxu0 %v488_v26  ;;  %v561_v11 = vld [vmem:[#allocation10 + $0x28] sm:$0xff] }
  0x5f   :  { %425 = vmatpush.msrb.mxu3 %v394_v54  ;;  %536 = vmatpush.msra.mxu1 %v529_v46  ;;  %v521_v54 = vld [vmem:[#allocation9 + $0x30] sm:$0xff] }
  0x60   :  { %464 = vmatpush.msra.mxu2 %v437_v13  ;;  %496 = vmatpush.msra.mxu0 %v487_v27  ;;  %v559_v13 = vld [vmem:[#allocation10 + $0x18] sm:$0xff] }
  0x61   :  { %426 = vmatpush.msrb.mxu3 %v393_v55  ;;  %537 = vmatpush.msra.mxu1 %v528_v47  ;;  %v520_v55 = vld [vmem:[#allocation9 + $0x28] sm:$0xff] }
  0x62   :  { %465 = vmatpush.msra.mxu2 %v436_v14  ;;  %497 = vmatpush.msra.mxu0 %v486_v28  ;;  %v617_v14 = vld [vmem:[%s936_s8] ss:$0 sm:$0xff] }
  0x63   :  { %427 = vmatpush.msrb.mxu3 %v392_v56  ;;  %538 = vmatpush.msra.mxu1 %v527_v48  ;;  %v519_v56 = vld [vmem:[#allocation9 + $0x20] sm:$0xff] }
  0x64   :  { %466 = vmatpush.msra.mxu2 %v435_v22  ;;  %498 = vmatpush.msra.mxu0 %v485_v29 }
  0x65   :  { %539 = vmatpush.msra.mxu1 %v526_v49  ;;  %576 = vmatpush.msra.mxu3 %v571_v1 }
  0x66   :  { %467 = vmatpush.msra.mxu2 %v434_v23  ;;  %499 = vmatpush.msra.mxu0 %v484_v30 }
  0x67   :  { %540 = vmatpush.msra.mxu1 %v525_v50 }
  0x68   :  { %468 = vmatpush.msra.mxu2 %v433_v24  ;;  %500 = vmatpush.msra.mxu0 %v483_v31 }
  0x69   :  { %541 = vmatpush.msra.mxu1 %v524_v51 }
  0x6a   :  { %501 = vmatpush.msra.mxu0 %v482_v32 }
  0x6b   :  { %542 = vmatpush.msra.mxu1 %v523_v52 }
  0x6c   :  { %502 = vmatpush.msra.mxu0 %v481_v33 }
  0x6d   :  { %543 = vmatpush.msra.mxu1 %v522_v53 }
  0x6e   :  { %503 = vmatpush.msra.mxu0 %v480_v34 }
  0x6f   :  { %544 = vmatpush.msra.mxu1 %v521_v54 }
  0x70   :  { %504 = vmatpush.msra.mxu0 %v479_v35 }
  0x71   :  { %545 = vmatpush.msra.mxu1 %v520_v55 }
  0x72   :  { %505 = vmatpush.msra.mxu0 %v478_v36 }
  0x73   :  { %546 = vmatpush.msra.mxu1 %v519_v56 }
  0x74   :  { %506 = vmatpush.msra.mxu0 %v477_v37 }
  0x75   :  { %547 = vmatpush.msra.mxu1 %v518_v57 }
  0x76   :  { %507 = vmatpush.msra.mxu0 %v476_v42 }
  0x78   :  { %508 = vmatpush.msra.mxu0 %v475_v43 }
  0x7a   :  { %509 = vmatpush.msra.mxu0 %v474_v44 }
  0xbf   :  { %v268_v62 = vpop.f32.mrf.mxu0 }
  0xc0   :  { %v269_v0 = vadd.f32 %v614_v60, %v268_v62  ;;  %v288_v2 = vpop.f32.mrf.mxu1  ;;  %v517_v62 = vld [vmem:[#allocation9 + $0x10] sm:$0xff] }
  0xc1   :  { %v308_v6 = vpop.f32.mrf.mxu2  ;;  %548 = vmatpush.msra.mxu1 %v517_v62 }
  0xc2   :  { %v289_v4 = vadd.f32 %v288_v2, %v269_v0  ;;  %v515_v0 = vld [vmem:[#allocation9] sm:$0xff]  ;;  %v570_v2 = vld [vmem:[#allocation10 + $0x70] sm:$0xff] }
  0xc3   :  { %549 = vmatpush.msra.mxu1 %v516_v63  ;;  %577 = vmatpush.msra.mxu3 %v570_v2 }
  0xc4   :  { %v309_v8 = vadd.f32 %v308_v6, %v289_v4  ;;  %v328_v10 = vpop.f32.mrf.mxu3  ;;  %v568_v4 = vld [vmem:[#allocation10 + $0x60] sm:$0xff]  ;;  %v566_v6 = vld [vmem:[#allocation10 + $0x50] sm:$0xff] }
  0xc5   :  { %550 = vmatpush.msra.mxu1 %v515_v0  ;;  %578 = vmatpush.msra.mxu3 %v569_v3 }
  0xc6   :  { %v329_v12 = vadd.f32 %v328_v10, %v309_v8  ;;  %v564_v8 = vld [vmem:[#allocation10 + $0x40] sm:$0xff]  ;;  %v562_v10 = vld [vmem:[#allocation10 + $0x30] sm:$0xff] }
  0xc7   :  { %579 = vmatpush.msra.mxu3 %v568_v4 }
  0xc9   :  { %v388_v18 = vpop.f32.mrf.mxu2  ;;  %580 = vmatpush.msra.mxu3 %v567_v5 }
  0xcb   :  { %581 = vmatpush.msra.mxu3 %v566_v6 }
  0xcd   :  { %582 = vmatpush.msra.mxu3 %v565_v7 }
  0xcf   :  { %583 = vmatpush.msra.mxu3 %v564_v8 }
  0xd1   :  { %584 = vmatpush.msra.mxu3 %v563_v9 }
  0xd3   :  { %585 = vmatpush.msra.mxu3 %v562_v10 }
  0xd5   :  { %586 = vmatpush.msra.mxu3 %v561_v11 }
  0xd7   :  { %v348_v15 = vpop.f32.mrf.mxu0 }
  0xd8   :  { %v368_v16 = vpop.f32.mrf.mxu1  ;;  %v349_v17 = vadd.f32 %v348_v15, %v329_v12  ;;  %v560_v12 = vld [vmem:[#allocation10 + $0x20] sm:$0xff] }
  0xd9   :  { %587 = vmatpush.msra.mxu3 %v560_v12 }
  0xda   :  { %v369_v19 = vadd.f32 %v368_v16, %v349_v17 }
  0xdb   :  { %588 = vmatpush.msra.mxu3 %v559_v13 }
  0xdc   :  { %v389_v20 = vadd.f32 %v388_v18, %v369_v19  ;;  %v558_v18 = vld [vmem:[#allocation10 + $0x10] sm:$0xff]  ;;  %v557_v19 = vld [vmem:[#allocation10 + $0x8] sm:$0xff] }
  0xdd   :  { %589 = vmatpush.msra.mxu3 %v558_v18 }
  0xde   :  { %v391_v21 = vmax.f32 %v389_v20, 0.0  ;;  %v556_v20 = vld [vmem:[#allocation10] sm:$0xff] }
  0xdf   :  { %590 = vmatpush.msra.mxu3 %v557_v19 }
  0xe0   :  { %428 = vmatmul.f32.vlgmr.msrb.gmra.mxu3 %v391_v21  ;;  %v618_v21 = vld [vmem:[%s938_s10] ss:$0 sm:$0xff] }
  0xe1   :  { %591 = vmatpush.msra.mxu3 %v556_v20 }
 0x163   :  { %v429_v39 = vpop.f32.mrf.mxu3 }
 0x164   :  { %v430_v40 = vadd.f32 %v615_v38, %v429_v39 }
 0x166   :  { %v432_v41 = vmax.f32 %v430_v40, 0.0 }
 0x168   :  { %469 = vmatmul.f32.vlgmr.msra.gmra.mxu2 %v432_v41 }
 0x1eb   :  { %v470_v59 = vpop.f32.mrf.mxu2 }
 0x1ec   :  { %v471_v60 = vadd.f32 %v616_v58, %v470_v59 }
 0x1ee   :  { %v473_v61 = vmax.f32 %v471_v60, 0.0 }
 0x1f0   :  { %510 = vmatmul.f32.vlgmr.msra.gmra.mxu0 %v473_v61 }
 0x26d   :  { %v511_v15 = vpop.f32.mrf.mxu0 }
 0x26e   :  { %v512_v16 = vadd.f32 %v617_v14, %v511_v15 }
 0x270   :  { %v514_v17 = vmax.f32 %v512_v16, 0.0 }
 0x272   :  { %551 = vmatmul.f32.vlgmr.msra.gmra.mxu1 %v514_v17 }
 0x2ef   :  { %v552_v22 = vpop.f32.mrf.mxu1 }
 0x2f0   :  { %v553_v23 = vadd.f32 %v618_v21, %v552_v22 }
 0x2f2   :  { %v555_v24 = vmax.f32 %v553_v23, 0.0 }
 0x2f4   :  { %592 = vmatmul.f32.vlgmr.msra.gmra.mxu3 %v555_v24 }
 0x377   :  { %v593_v26 = vpop.f32.mrf.mxu3 }
 0x378   :  { %v594_v27 = vadd.f32 %v619_v25, %v593_v26 }
 0x37a   :  { %596 = vst [vmem:[%s941_s13] sm:$0xff] %v594_v27 }
 0x37b   :  { %601 = vsyncpa [#allocation3], 1 }
 0x37c   :  { %602 = vsyncpa [#allocation5], 1 }
 0x37d   :  { %603 = vsyncpa [#allocation8], 1 }
 0x37e   :  { %604 = vsyncpa [#allocation11], 1 }

</bundles_post_ra>
